<compile_context>
chip_gen: v5e
topology: v5e:2x2
jax: 0.10.0
libtpu: 0.0.40
codegen_flags: <defaults>
</compile_context>

<pallas_src>
import jax
import jax.numpy as jnp
from jax.experimental import pallas as pl
from jax.experimental.pallas import tpu as pltpu

_SUBLANE = 8


def _round_up(n, m):
    return ((n + m - 1) // m) * m


def autoencoder_kernel(x_ref,
                       w1_ref, b1_ref,
                       w2_ref, b2_ref,
                       w3_ref, b3_ref,
                       w4_ref, b4_ref,
                       out_ref):
    """One batch tile of the fused encoder+decoder (4 MXU matmuls)."""
    wdt = w1_ref.dtype                      # compute dtype for MXU inputs
    x = x_ref[...].astype(wdt)              # cast in-kernel: no extra HBM pass

    # encoder
    h = jnp.dot(x, w1_ref[...], preferred_element_type=jnp.float32) + b1_ref[...]
    h = jnp.maximum(h, 0.0).astype(wdt)
    z = jnp.dot(h, w2_ref[...], preferred_element_type=jnp.float32) + b2_ref[...]
    z = jnp.maximum(z, 0.0).astype(wdt)

    # decoder
    h = jnp.dot(z, w3_ref[...], preferred_element_type=jnp.float32) + b3_ref[...]
    h = jnp.maximum(h, 0.0).astype(wdt)
    logits = jnp.dot(h, w4_ref[...], preferred_element_type=jnp.float32) + b4_ref[...]

    # sigmoid: exact lax.logistic lowering (exp lands on the otherwise-idle EUP)
    out_ref[...] = jax.nn.sigmoid(logits).astype(out_ref.dtype)


def prepare_params(params, *, use_bf16=True):
    """One-time weight prep (hoisted out of the per-call path).

    Weights cast to bf16 by default (f32 MXU accumulation keeps accuracy);
    biases stay f32 so all elementwise math runs in f32 (also avoids extra
    converts on v5e, which has no bf16 VPU/EUP).
    """
    wdt = jnp.bfloat16 if use_bf16 else jnp.float32

    def w(a):
        return jnp.asarray(a, wdt)

    def b(a):
        return jnp.asarray(a, jnp.float32).reshape(1, -1)

    return (w(params["w1"]), b(params["b1"]),
            w(params["w2"]), b(params["b2"]),
            w(params["w3"]), b(params["b3"]),
            w(params["w4"]), b(params["b4"]))


def _pick_batch_tile(batch, requested):
    """Batch tile: large (amortize ~0.35us/step), multiple of 8, but capped so
    the batch yields >= 4 grid steps when it can (v7x megacore sharding)."""
    if requested is not None:
        tb = max(_SUBLANE, _round_up(requested, _SUBLANE))
    else:
        tb = 2048
    tb = min(tb, max(_SUBLANE, _round_up(pl.cdiv(batch, 4), _SUBLANE)))
    if tb >= batch:
        tb = batch          # single full-extent tile (legal for any batch)
    return tb


def autoencoder_forward(x, prepared, *, batch_tile=None):
    """x: (B, input_dim).  prepared: output of prepare_params."""
    w1, b1, w2, b2, w3, b3, w4, b4 = prepared
    B, input_dim = x.shape
    hidden = w1.shape[1]
    latent = w2.shape[1]
    assert w1.shape[0] == input_dim and w4.shape[1] == input_dim

    tb = _pick_batch_tile(B, batch_tile)
    grid = (pl.cdiv(B, tb),)

    # Weights/biases: full-array blocks with a constant index_map -> resident
    # in VMEM across all batch tiles.
    def full_spec(arr):
        return pl.BlockSpec(arr.shape, lambda i: (0, 0))

    in_specs = [
        pl.BlockSpec((tb, input_dim), lambda i: (i, 0)),   # x batch tile (native lane width)
        full_spec(w1), full_spec(b1),
        full_spec(w2), full_spec(b2),
        full_spec(w3), full_spec(b3),
        full_spec(w4), full_spec(b4),
    ]
    out_spec = pl.BlockSpec((tb, input_dim), lambda i: (i, 0))

    # Advisory cost estimate on the TRUE (unpadded) dimensions.
    weight_bytes = sum(int(a.size) * a.dtype.itemsize
                       for a in (w1, b1, w2, b2, w3, b3, w4, b4))
    flops = 2 * B * (input_dim * hidden + hidden * latent
                     + latent * hidden + hidden * input_dim)
    bytes_accessed = (B * input_dim * x.dtype.itemsize      # x read
                      + B * input_dim * 4                    # out write (f32)
                      + weight_bytes)
    cost = pl.CostEstimate(flops=flops,
                           transcendentals=B * input_dim,
                           bytes_accessed=bytes_accessed)

    # Deliberate scoped-VMEM budget: generous for the tile working set, but
    # capped at 48 MiB so there is headroom under v7x's 64 MiB physical VMEM.
    act_bytes = tb * (2 * hidden + latent + input_dim) * 4       # f32 activations
    tile_bytes = (2 * tb * input_dim * x.dtype.itemsize          # x tile, 2 bufs
                  + 2 * tb * input_dim * 4                       # out tile, 2 bufs
                  + 2 * weight_bytes                             # resident weights
                  + act_bytes)
    vmem_limit = int(min(48 * 1024 * 1024,
                         max(32 * 1024 * 1024, 4 * tile_bytes)))

    return pl.pallas_call(
        autoencoder_kernel,
        out_shape=jax.ShapeDtypeStruct((B, input_dim), jnp.float32),
        grid_spec=pltpu.PrefetchScalarGridSpec(
            num_scalar_prefetch=0,
            grid=grid,
            in_specs=in_specs,
            out_specs=out_spec,
        ),
        compiler_params=pltpu.CompilerParams(
            dimension_semantics=("parallel",),
            vmem_limit_bytes=vmem_limit,
        ),
        cost_estimate=cost,
    )(x, w1, b1, w2, b2, w3, b3, w4, b4)


def init_params(key, input_dim, latent_dim=32, hidden=128):
    """Deterministic synthetic init (PyTorch-Linear-like uniform fan_in scaling)."""
    def linear(key, fan_in, fan_out):
        kw, kb = jax.random.split(key)
        bound = 1.0 / (fan_in ** 0.5)
        w = jax.random.uniform(kw, (fan_in, fan_out), jnp.float32, -bound, bound)
        b = jax.random.uniform(kb, (1, fan_out), jnp.float32, -bound, bound)
        return w, b

    k1, k2, k3, k4 = jax.random.split(key, 4)
    w1, b1 = linear(k1, input_dim, hidden)
    w2, b2 = linear(k2, hidden, latent_dim)
    w3, b3 = linear(k3, latent_dim, hidden)
    w4, b4 = linear(k4, hidden, input_dim)
    return {"w1": w1, "b1": b1, "w2": w2, "b2": b2,
            "w3": w3, "b3": b3, "w4": w4, "b4": b4}


def autoencoder_reference(x, p):
    h1 = jnp.maximum(x @ p["w1"] + p["b1"], 0.0)
    z = jnp.maximum(h1 @ p["w2"] + p["b2"], 0.0)
    h2 = jnp.maximum(z @ p["w3"] + p["b3"], 0.0)
    return jax.nn.sigmoid(h2 @ p["w4"] + p["b4"])


if __name__ == "__main__":
    key = jax.random.PRNGKey(0)
    kx, kp, kx2, kx3 = jax.random.split(key, 4)

    batch = 8
    input_dim = 64    # e.g. perfume feature vector length
    latent_dim = 32

    x = jax.random.uniform(kx, (batch, input_dim), jnp.float32)
    params = init_params(kp, input_dim, latent_dim)

    # Exact f32 path (matches the PyTorch module's f32 semantics to 1e-5).
    prep_f32 = prepare_params(params, use_bf16=False)
    out = jax.block_until_ready(autoencoder_forward(x, prep_f32))
    ref = autoencoder_reference(x, params)
    assert out.shape == (batch, input_dim)
    assert jnp.allclose(out, ref, atol=1e-5, rtol=1e-5)

    # Multi-tile path with a ragged last tile: B=20, tb=8 -> grid of 3.
    x2 = jax.random.uniform(kx2, (20, input_dim), jnp.float32)
    out2 = jax.block_until_ready(autoencoder_forward(x2, prep_f32, batch_tile=8))
    ref2 = autoencoder_reference(x2, params)
    assert out2.shape == (20, input_dim)
    assert jnp.allclose(out2, ref2, atol=1e-5, rtol=1e-5)

    # Larger batch, default tiling -> tb capped so grid has >= 4 steps.
    x3 = jax.random.uniform(kx3, (1024, input_dim), jnp.float32)
    out3 = jax.block_until_ready(autoencoder_forward(x3, prep_f32))
    ref3 = autoencoder_reference(x3, params)
    assert jnp.allclose(out3, ref3, atol=1e-5, rtol=1e-5)

    # Production bf16-weight path (f32 MXU accumulation): looser tolerance.
    prep_bf16 = prepare_params(params, use_bf16=True)
    out_bf = jax.block_until_ready(autoencoder_forward(x3, prep_bf16))
    assert out_bf.shape == (1024, input_dim)
    assert jnp.allclose(out_bf, ref3, atol=3e-2, rtol=0)

    print("KERNEL_OK")
</pallas_src>

<mosaic_0001>
module attributes {stable_mosaic.version = 11 : i64} {
  func.func @autoencoder_kernel(%arg0: i32, %arg1: memref<8x64xf32, #tpu.memory_space<vmem>>, %arg2: memref<64x128xf32, #tpu.memory_space<vmem>>, %arg3: memref<1x128xf32, #tpu.memory_space<vmem>>, %arg4: memref<128x32xf32, #tpu.memory_space<vmem>>, %arg5: memref<1x32xf32, #tpu.memory_space<vmem>>, %arg6: memref<32x128xf32, #tpu.memory_space<vmem>>, %arg7: memref<1x128xf32, #tpu.memory_space<vmem>>, %arg8: memref<128x64xf32, #tpu.memory_space<vmem>>, %arg9: memref<1x64xf32, #tpu.memory_space<vmem>>, %arg10: memref<8x64xf32, #tpu.memory_space<vmem>>) attributes {dimension_semantics = [#tpu.dimension_semantics<parallel>], iteration_bounds = array<i64: 1>, scalar_prefetch = 0 : i64, scratch_operands = 0 : i64, tpu.core_type = #tpu.core_type<tc>, window_params = [{transform_indices = @transform_0, window_bounds = array<i64: 8, 64>}, {pipeline_mode = #tpu.pipeline_mode<synchronous>, transform_indices = @transform_1, window_bounds = array<i64: 64, 128>}, {pipeline_mode = #tpu.pipeline_mode<synchronous>, transform_indices = @transform_2, window_bounds = array<i64: 1, 128>}, {pipeline_mode = #tpu.pipeline_mode<synchronous>, transform_indices = @transform_3, window_bounds = array<i64: 128, 32>}, {pipeline_mode = #tpu.pipeline_mode<synchronous>, transform_indices = @transform_4, window_bounds = array<i64: 1, 32>}, {pipeline_mode = #tpu.pipeline_mode<synchronous>, transform_indices = @transform_5, window_bounds = array<i64: 32, 128>}, {pipeline_mode = #tpu.pipeline_mode<synchronous>, transform_indices = @transform_6, window_bounds = array<i64: 1, 128>}, {pipeline_mode = #tpu.pipeline_mode<synchronous>, transform_indices = @transform_7, window_bounds = array<i64: 128, 64>}, {pipeline_mode = #tpu.pipeline_mode<synchronous>, transform_indices = @transform_8, window_bounds = array<i64: 1, 64>}, {transform_indices = @transform_9, window_bounds = array<i64: 8, 64>}]} {
    %c0 = arith.constant 0 : index
    %c0_0 = arith.constant 0 : index
    %0 = vector.load %arg1[%c0, %c0_0] : memref<8x64xf32, #tpu.memory_space<vmem>>, vector<8x64xf32>
    %c0_1 = arith.constant 0 : index
    %c0_2 = arith.constant 0 : index
    %1 = vector.load %arg2[%c0_1, %c0_2] : memref<64x128xf32, #tpu.memory_space<vmem>>, vector<64x128xf32>
    %cst = arith.constant dense<0.000000e+00> : vector<8x128xf32>
    %2 = tpu.matmul %0, %1, %cst {dimension_numbers = #tpu.dot_dimension_numbers<[1], [0], [0], [1], [0, 0, 1, 1], [], []>} : vector<8x64xf32>, vector<64x128xf32>, vector<8x128xf32> -> vector<8x128xf32>
    %c0_3 = arith.constant 0 : index
    %c0_4 = arith.constant 0 : index
    %3 = vector.load %arg3[%c0_3, %c0_4] : memref<1x128xf32, #tpu.memory_space<vmem>>, vector<1x128xf32>
    %4 = vector.broadcast %3 : vector<1x128xf32> to vector<8x128xf32>
    %5 = arith.addf %2, %4 : vector<8x128xf32>
    %cst_5 = arith.constant 0.000000e+00 : f32
    %6 = vector.broadcast %cst_5 : f32 to vector<8x128xf32>
    %7 = arith.maximumf %5, %6 : vector<8x128xf32>
    %c0_6 = arith.constant 0 : index
    %c0_7 = arith.constant 0 : index
    %8 = vector.load %arg4[%c0_6, %c0_7] : memref<128x32xf32, #tpu.memory_space<vmem>>, vector<128x32xf32>
    %cst_8 = arith.constant dense<0.000000e+00> : vector<8x32xf32>
    %9 = tpu.matmul %7, %8, %cst_8 {dimension_numbers = #tpu.dot_dimension_numbers<[1], [0], [0], [1], [0, 0, 1, 1], [], []>} : vector<8x128xf32>, vector<128x32xf32>, vector<8x32xf32> -> vector<8x32xf32>
    %c0_9 = arith.constant 0 : index
    %c0_10 = arith.constant 0 : index
    %10 = vector.load %arg5[%c0_9, %c0_10] : memref<1x32xf32, #tpu.memory_space<vmem>>, vector<1x32xf32>
    %11 = vector.broadcast %10 : vector<1x32xf32> to vector<8x32xf32>
    %12 = arith.addf %9, %11 : vector<8x32xf32>
    %cst_11 = arith.constant 0.000000e+00 : f32
    %13 = vector.broadcast %cst_11 : f32 to vector<8x32xf32>
    %14 = arith.maximumf %12, %13 : vector<8x32xf32>
    %c0_12 = arith.constant 0 : index
    %c0_13 = arith.constant 0 : index
    %15 = vector.load %arg6[%c0_12, %c0_13] : memref<32x128xf32, #tpu.memory_space<vmem>>, vector<32x128xf32>
    %cst_14 = arith.constant dense<0.000000e+00> : vector<8x128xf32>
    %16 = tpu.matmul %14, %15, %cst_14 {dimension_numbers = #tpu.dot_dimension_numbers<[1], [0], [0], [1], [0, 0, 1, 1], [], []>} : vector<8x32xf32>, vector<32x128xf32>, vector<8x128xf32> -> vector<8x128xf32>
    %c0_15 = arith.constant 0 : index
    %c0_16 = arith.constant 0 : index
    %17 = vector.load %arg7[%c0_15, %c0_16] : memref<1x128xf32, #tpu.memory_space<vmem>>, vector<1x128xf32>
    %18 = vector.broadcast %17 : vector<1x128xf32> to vector<8x128xf32>
    %19 = arith.addf %16, %18 : vector<8x128xf32>
    %cst_17 = arith.constant 0.000000e+00 : f32
    %20 = vector.broadcast %cst_17 : f32 to vector<8x128xf32>
    %21 = arith.maximumf %19, %20 : vector<8x128xf32>
    %c0_18 = arith.constant 0 : index
    %c0_19 = arith.constant 0 : index
    %22 = vector.load %arg8[%c0_18, %c0_19] : memref<128x64xf32, #tpu.memory_space<vmem>>, vector<128x64xf32>
    %cst_20 = arith.constant dense<0.000000e+00> : vector<8x64xf32>
    %23 = tpu.matmul %21, %22, %cst_20 {dimension_numbers = #tpu.dot_dimension_numbers<[1], [0], [0], [1], [0, 0, 1, 1], [], []>} : vector<8x128xf32>, vector<128x64xf32>, vector<8x64xf32> -> vector<8x64xf32>
    %c0_21 = arith.constant 0 : index
    %c0_22 = arith.constant 0 : index
    %24 = vector.load %arg9[%c0_21, %c0_22] : memref<1x64xf32, #tpu.memory_space<vmem>>, vector<1x64xf32>
    %25 = vector.broadcast %24 : vector<1x64xf32> to vector<8x64xf32>
    %26 = arith.addf %23, %25 : vector<8x64xf32>
    %27 = arith.negf %26 : vector<8x64xf32>
    %28 = math.exp %27 : vector<8x64xf32>
    %cst_23 = arith.constant 1.000000e+00 : f32
    %29 = vector.broadcast %cst_23 : f32 to vector<8x64xf32>
    %30 = arith.addf %29, %28 : vector<8x64xf32>
    %31 = arith.divf %29, %30 : vector<8x64xf32>
    %c0_24 = arith.constant 0 : index
    %c0_25 = arith.constant 0 : index
    %32 = vector.load %arg10[%c0_24, %c0_25] : memref<8x64xf32, #tpu.memory_space<vmem>>, vector<8x64xf32>
    tpu.vector_store %arg10[%c0_24, %c0_25], %31 {strides = array<i32>} : memref<8x64xf32, #tpu.memory_space<vmem>>, vector<8x64xf32>,
    return
  }
  func.func @transform_0(%arg0: i32) -> (i32, i32) {
    %c0_i32 = arith.constant 0 : i32
    %c0_i32_0 = arith.constant 0 : i32
    return %arg0, %c0_i32 : i32, i32
  }
  func.func @transform_1(%arg0: i32) -> (i32, i32) {
    %c0_i32 = arith.constant 0 : i32
    %c0_i32_0 = arith.constant 0 : i32
    %c0_i32_1 = arith.constant 0 : i32
    return %c0_i32, %c0_i32_0 : i32, i32
  }
  func.func @transform_2(%arg0: i32) -> (i32, i32) {
    %c0_i32 = arith.constant 0 : i32
    %c0_i32_0 = arith.constant 0 : i32
    %c0_i32_1 = arith.constant 0 : i32
    return %c0_i32, %c0_i32_0 : i32, i32
  }
  func.func @transform_3(%arg0: i32) -> (i32, i32) {
    %c0_i32 = arith.constant 0 : i32
    %c0_i32_0 = arith.constant 0 : i32
    %c0_i32_1 = arith.constant 0 : i32
    return %c0_i32, %c0_i32_0 : i32, i32
  }
  func.func @transform_4(%arg0: i32) -> (i32, i32) {
    %c0_i32 = arith.constant 0 : i32
    %c0_i32_0 = arith.constant 0 : i32
    %c0_i32_1 = arith.constant 0 : i32
    return %c0_i32, %c0_i32_0 : i32, i32
  }
  func.func @transform_5(%arg0: i32) -> (i32, i32) {
    %c0_i32 = arith.constant 0 : i32
    %c0_i32_0 = arith.constant 0 : i32
    %c0_i32_1 = arith.constant 0 : i32
    return %c0_i32, %c0_i32_0 : i32, i32
  }
  func.func @transform_6(%arg0: i32) -> (i32, i32) {
    %c0_i32 = arith.constant 0 : i32
    %c0_i32_0 = arith.constant 0 : i32
    %c0_i32_1 = arith.constant 0 : i32
    return %c0_i32, %c0_i32_0 : i32, i32
  }
  func.func @transform_7(%arg0: i32) -> (i32, i32) {
    %c0_i32 = arith.constant 0 : i32
    %c0_i32_0 = arith.constant 0 : i32
    %c0_i32_1 = arith.constant 0 : i32
    return %c0_i32, %c0_i32_0 : i32, i32
  }
  func.func @transform_8(%arg0: i32) -> (i32, i32) {
    %c0_i32 = arith.constant 0 : i32
    %c0_i32_0 = arith.constant 0 : i32
    %c0_i32_1 = arith.constant 0 : i32
    return %c0_i32, %c0_i32_0 : i32, i32
  }
  func.func @transform_9(%arg0: i32) -> (i32, i32) {
    %c0_i32 = arith.constant 0 : i32
    %c0_i32_0 = arith.constant 0 : i32
    return %arg0, %c0_i32 : i32, i32
  }
}

</mosaic_0001>

<bundles_post_ra>
// kernel: tpu_custom_call.1
= control target key start
LH: loop header
LB: loop body
LE: loop exit
PB: predicated region body
PF: predicated region fallthrough
CT: control target
= control target key end

     0   :  { %s462_s0 = inlined_call_operand.vmem [shape: f32[8,64], index: 0, kind: input, shape index: {}]   ;;  %s463_s1 = inlined_call_operand.vmem [shape: f32[64,128], index: 1, kind: input, shape index: {}]   ;;  %s464_s2 = inlined_call_operand.vmem [shape: f32[1,128], index: 2, kind: input, shape index: {}]   ;;  %s465_s3 = inlined_call_operand.vmem [shape: f32[128,32], index: 3, kind: input, shape index: {}]   ;;  %s466_s4 = inlined_call_operand.vmem [shape: f32[1,32], index: 4, kind: input, shape index: {}]   ;;  %s467_s5 = inlined_call_operand.vmem [shape: f32[32,128], index: 5, kind: input, shape index: {}]   ;;  %s468_s6 = inlined_call_operand.vmem [shape: f32[1,128], index: 6, kind: input, shape index: {}]   ;;  %s469_s7 = inlined_call_operand.vmem [shape: f32[128,64], index: 7, kind: input, shape index: {}]   ;;  %s470_s8 = inlined_call_operand.vmem [shape: f32[1,64], index: 8, kind: input, shape index: {}]   ;;  %s471_s9 = inlined_call_operand.hbm [shape: f32[8,64], index: 9, kind: output, shape index: {}]  }
   0x1   :  { %v41_v0 = vld [vmem:[%s463_s1 + $0x38] sm:$0xff]  ;;  %v40_v1 = vld [vmem:[%s463_s1 + $0x30] sm:$0xff]  ;;  %v39_v2 = vld [vmem:[%s463_s1 + $0x28] sm:$0xff] }
   0x2   :  { %58 = vmatpush.msra.mxu0 %v41_v0  ;;  %v86_v3 = vld [vmem:[%s465_s3 + $0x78] sm:$0xff]  ;;  %v85_v4 = vld [vmem:[%s465_s3 + $0x70] sm:$0xff]  ;;  %v38_v5 = vld [vmem:[%s463_s1 + $0x20] sm:$0xff] }
   0x3   :  { %91 = vmatpush.msra.mxu1 %v86_v3  ;;  %v84_v6 = vld [vmem:[%s465_s3 + $0x68] sm:$0xff]  ;;  %v37_v7 = vld [vmem:[%s463_s1 + $0x18] sm:$0xff]  ;;  %v36_v8 = vld [vmem:[%s463_s1 + $0x10] sm:$0xff] }
   0x4   :  { %59 = vmatpush.msra.mxu0 %v40_v1  ;;  %v83_v9 = vld [vmem:[%s465_s3 + $0x60] sm:$0xff]  ;;  %v82_v10 = vld [vmem:[%s465_s3 + $0x58] sm:$0xff] }
   0x5   :  { %92 = vmatpush.msra.mxu1 %v85_v4 }
   0x6   :  { %60 = vmatpush.msra.mxu0 %v39_v2 }
   0x7   :  { %93 = vmatpush.msra.mxu1 %v84_v6 }
   0x8   :  { %61 = vmatpush.msra.mxu0 %v38_v5 }
   0xa   :  { %62 = vmatpush.msra.mxu0 %v37_v7 }
   0xb   :  { %14 = vsyncpa [#allocation3], 0  ;;  %v35_v11 = vld [vmem:[%s463_s1 + $0x8] sm:$0xff]  ;;  %94 = vmatpush.msra.mxu1 %v83_v9  ;;  %v81_v12 = vld [vmem:[%s465_s3 + $0x50] sm:$0xff]  ;;  %vm46_vm0 = vcmask 523264   ;;  %vm120_vm1 = vcmask 261120  }
   0xc   :  { %63 = vmatpush.msra.mxu0 %v36_v8  ;;  %v34_v13 = vld [vmem:[%s463_s1] sm:$0xff]  ;;  %v80_v15 = vld [vmem:[%s465_s3 + $0x48] sm:$0xff]  ;;  %v78_v17 = vld [vmem:[%s465_s3 + $0x38] sm:$0xff] }
   0xd   :  { %95 = vmatpush.msra.mxu1 %v82_v10  ;;  %v33_v14 = vld [vmem:[%s462_s0] sm:$0xff]  ;;  %v77_v18 = vld [vmem:[%s465_s3 + $0x30] sm:$0xff]  ;;  %v76_v19 = vld [vmem:[%s465_s3 + $0x28] sm:$0xff] }
   0xe   :  { %64 = vmatpush.msra.mxu0 %v35_v11  ;;  %v79_v16 = vld [vmem:[%s465_s3 + $0x40] sm:$0xff]  ;;  %v74_v21 = vld [vmem:[%s465_s3 + $0x18] sm:$0xff]  ;;  %v73_v22 = vld [vmem:[%s465_s3 + $0x10] sm:$0xff] }
   0xf   :  { %96 = vmatpush.msra.mxu1 %v81_v12  ;;  %v75_v20 = vld [vmem:[%s465_s3 + $0x20] sm:$0xff]  ;;  %v72_v23 = vld [vmem:[%s465_s3 + $0x8] sm:$0xff]  ;;  %v115_v25 = vld [vmem:[%s467_s5 + $0x18] sm:$0xff] }
  0x10   :  { %65 = vmatpush.msra.mxu0 %v34_v13  ;;  %v71_v24 = vld [vmem:[%s465_s3] sm:$0xff]  ;;  %136 = vmatpush.msra.mxu2 %v115_v25  ;;  %v114_v30 = vld [vmem:[%s467_s5 + $0x10] sm:$0xff]  ;;  %v113_v31 = vld [vmem:[%s467_s5 + $0x8] sm:$0xff] }
  0x11   :  { %221 = vmatmul.msk.f32.vlgmr.msra.gmra.mxu0 %vm46_vm0, %v33_v14  ;;  %97 = vmatpush.msra.mxu1 %v80_v15  ;;  %v225_v26 = vld [vmem:[%s464_s2] ss:$0 sm:$0xff]  ;;  %v160_v33 = vld [vmem:[%s469_s7 + $0x78] sm:$0xff]  ;;  %v159_v34 = vld [vmem:[%s469_s7 + $0x70] sm:$0xff] }
  0x12   :  { %137 = vmatpush.msra.mxu2 %v114_v30  ;;  %v112_v32 = vld [vmem:[%s467_s5] sm:$0xff]  ;;  %165 = vmatpush.msra.mxu3 %v160_v33  ;;  %v158_v35 = vld [vmem:[%s469_s7 + $0x68] sm:$0xff]  ;;  %v156_v37 = vld [vmem:[%s469_s7 + $0x58] sm:$0xff] }
  0x13   :  { %98 = vmatpush.msra.mxu1 %v79_v16  ;;  %v157_v36 = vld [vmem:[%s469_s7 + $0x60] sm:$0xff]  ;;  %v155_v38 = vld [vmem:[%s469_s7 + $0x50] sm:$0xff]  ;;  %v154_v39 = vld [vmem:[%s469_s7 + $0x48] sm:$0xff] }
  0x14   :  { %138 = vmatpush.msra.mxu2 %v113_v31  ;;  %166 = vmatpush.msra.mxu3 %v159_v34  ;;  %v153_v40 = vld [vmem:[%s469_s7 + $0x40] sm:$0xff]  ;;  %v152_v41 = vld [vmem:[%s469_s7 + $0x38] sm:$0xff]  ;;  %v151_v42 = vld [vmem:[%s469_s7 + $0x30] sm:$0xff] }
  0x15   :  { %99 = vmatpush.msra.mxu1 %v78_v17  ;;  %v150_v43 = vld [vmem:[%s469_s7 + $0x28] sm:$0xff]  ;;  %v149_v44 = vld [vmem:[%s469_s7 + $0x20] sm:$0xff]  ;;  %v148_v45 = vld [vmem:[%s469_s7 + $0x18] sm:$0xff] }
  0x16   :  { %139 = vmatpush.msra.mxu2 %v112_v32  ;;  %167 = vmatpush.msra.mxu3 %v158_v35  ;;  %v226_v46 = vld [vmem:[%s466_s4] ss:$0 sm:$0xff]  ;;  %v147_v50 = vld [vmem:[%s469_s7 + $0x10] sm:$0xff]  ;;  %v146_v51 = vld [vmem:[%s469_s7 + $0x8] sm:$0xff] }
  0x17   :  { %100 = vmatpush.msra.mxu1 %v77_v18  ;;  %v145_v52 = vld [vmem:[%s469_s7] sm:$0xff] }
  0x18   :  { %168 = vmatpush.msra.mxu3 %v157_v36  ;;  %v227_v53 = vld [vmem:[%s468_s6] ss:$0 sm:$0xff]  ;;  %s259_s6 = smov [#allocation2]  }
  0x19   :  { %101 = vmatpush.msra.mxu1 %v76_v19  ;;  %v228_v57 = vld [vmem:[%s470_s8] ss:$0 sm:$0xff]  ;;  %s210_s7 = sshll.u32 %s259_s6, 4  ;;  %s212_s8 = sshll.u32 %s471_s9, 4  ;;  %s211_s7 = int_to_ptr.vmem [resolvable:$true] %s210_s7  ;;  %s213_s8 = int_to_ptr.hbm [resolvable:$true] %s212_s8 }
  0x1a   :  { %169 = vmatpush.msra.mxu3 %v156_v37 }
  0x1b   :  { %102 = vmatpush.msra.mxu1 %v75_v20 }
  0x1c   :  { %170 = vmatpush.msra.mxu3 %v155_v38 }
  0x1d   :  { %103 = vmatpush.msra.mxu1 %v74_v21 }
  0x1e   :  { %171 = vmatpush.msra.mxu3 %v154_v39 }
  0x1f   :  { %104 = vmatpush.msra.mxu1 %v73_v22 }
  0x20   :  { %172 = vmatpush.msra.mxu3 %v153_v40 }
  0x21   :  { %105 = vmatpush.msra.mxu1 %v72_v23 }
  0x22   :  { %173 = vmatpush.msra.mxu3 %v152_v41 }
  0x23   :  { %106 = vmatpush.msra.mxu1 %v71_v24 }
  0x24   :  { %174 = vmatpush.msra.mxu3 %v151_v42 }
  0x26   :  { %175 = vmatpush.msra.mxu3 %v150_v43 }
  0x28   :  { %176 = vmatpush.msra.mxu3 %v149_v44 }
  0x2a   :  { %177 = vmatpush.msra.mxu3 %v148_v45 }
  0x2c   :  { %178 = vmatpush.msra.mxu3 %v147_v50 }
  0x2e   :  { %179 = vmatpush.msra.mxu3 %v146_v51 }
  0x30   :  { %180 = vmatpush.msra.mxu3 %v145_v52 }
  0x8e   :  { %v67_v27 = vpop.f32.mrf.mxu0 }
  0x8f   :  { %v68_v28 = vadd.f32 %v225_v26, %v67_v27 }
  0x91   :  { %v70_v29 = vmax.f32 %v68_v28, 0.0 }
  0x93   :  { %107 = vmatmul.f32.vlgmr.msra.gmra.mxu1 %v70_v29 }
 0x110   :  { %v108_v47 = vpop.f32.mrf.mxu1 }
 0x111   :  { %v109_v48 = vadd.f32 %v226_v46, %v108_v47 }
 0x113   :  { %v111_v49 = vmax.f32 %v109_v48, 0.0 }
 0x115   :  { %222 = vmatmul.msk.f32.vlgmr.msra.gmra.mxu2 %vm120_vm1, %v111_v49 }
 0x198   :  { %v141_v54 = vpop.f32.mrf.mxu2 }
 0x199   :  { %v142_v55 = vadd.f32 %v227_v53, %v141_v54 }
 0x19b   :  { %v144_v56 = vmax.f32 %v142_v55, 0.0 }
 0x19d   :  { %181 = vmatmul.f32.vlgmr.msra.gmra.mxu3 %v144_v56 }
 0x220   :  { %v182_v58 = vpop.f32.mrf.mxu3 }
 0x221   :  { %v183_v59 = vadd.f32 %v228_v57, %v182_v58 }
 0x223   :  { %v223_v60 = vmul.f32 -1.442695, %v183_v59 }
 0x225   :  { %229 = vpow2.f32 %v223_v60 }
 0x22b   :  { %v230_v61 = vpop.eup %229 }
 0x22c   :  { %v188_v62 = vadd.f32 1.0, %v230_v61 }
 0x22e   :  { %231 = vrcp.f32 %v188_v62  ;;  %v200_v2 = vand.u32 2147483648, %v188_v62  ;;  %v198_v4 = vand.u32 2147483647, %v188_v62  ;;  %vm194_vm3 = vweird.f32 %v188_v62 }
 0x230   :  { %v201_v6 = vor.u32 1.1754944e-38, %v200_v2  ;;  %vm199_vm5 = vcmp.eq.f32.partialorder %v198_v4, 8.507059e+37 }
 0x234   :  { %v232_v63 = vpop.eup %231 }
 0x235   :  { %v190_v0 = vmul.f32 %v232_v63, %v188_v62  ;;  %vm195_vm2 = vweird.f32 %v232_v63 }
 0x236   :  { %vm196_vm4 = vmor %vm194_vm3, %vm195_vm2 }
 0x237   :  { %v191_v1 = vsub.f32 1.0, %v190_v0 }
 0x239   :  { %v192_v3 = vmul.f32 %v232_v63, %v191_v1 }
 0x23b   :  { %v193_v5 = vadd.f32 %v232_v63, %v192_v3 }
 0x23d   :  { %v197_v7 = vsel %vm196_vm4, %v232_v63, %v193_v5 }
 0x23e   :  { %v202_v8 = vsel %vm199_vm5, %v201_v6, %v197_v7 }
 0x23f   :  { %204 = vst.msk [vmem:[#allocation2] sm:$0xff] %vm46_vm0, %v202_v8 }
 0x240   :  { %215 = dma.vmem_to_hbm [thread:$0]  %s211_s7, 128, %s213_s8, [#allocation3]  }
 0x241   :  { %257 = dma.done.wait [#allocation3], 128  }
 0x242   :  { %258 = vsyncadd [#allocation3], 4294967168 }
 0x243   :  { %220 = vsyncpa [#allocation3], 1 }

</bundles_post_ra>
